<compile_context>
chip_gen: v7x
topology: tpu7x:2x2x1
jax: 0.10.0
libtpu: 0.0.40
codegen_flags: <defaults>
</compile_context>

<pallas_src>
import functools
import math

import jax
import jax.numpy as jnp
from jax.experimental import pallas as pl
from jax.experimental.pallas import tpu as pltpu


# ----------------------------- helpers --------------------------------------


def _largest_divisor(n, candidates):
    for c in candidates:
        if c <= n and n % c == 0:
            return c
    return n


def _pick_block_rows(m):
    # Cap at 256: safe under v5e's 16 MiB scoped-VMEM default, ~63%+ of HBM roofline.
    return _largest_divisor(m, (256, 128, 64, 32, 16, 8))


def _pick_tq(s):
    # Cap query tile at 128 so the (tq, S) prob buffers fit v7x's 64 MiB VMEM.
    return _largest_divisor(s, (128, 64, 32, 16, 8))


# ----------------------------- QKV projection --------------------------------


def _qkv_kernel(x_ref, w_ref, q_ref, k_ref, v_ref, *, n):
    # x: (bm, E) f32; w: (E, 3n) bf16 (wq|wk|wv pre-concatenated, scale folded into wq).
    # qkv_bias=False -> no bias operand.  One MXU pass, three lane-slice stores.
    x = x_ref[...].astype(jnp.bfloat16)
    y = jnp.dot(x, w_ref[...], preferred_element_type=jnp.float32)   # (bm, 3n) f32
    q_ref[...] = y[:, :n].astype(q_ref.dtype)
    k_ref[...] = y[:, n:2 * n].astype(k_ref.dtype)
    v_ref[...] = y[:, 2 * n:].astype(v_ref.dtype)


def _qkv_proj(x2d, w_qkv, bm):
    M, E = x2d.shape
    n3 = w_qkv.shape[1]
    n = n3 // 3
    out_sds = jax.ShapeDtypeStruct((M, n), jnp.bfloat16)   # bf16 intermediates
    # TODO(synk): at realistic embed sizes add a K-axis grid + f32 accumulator and
    # pipeline_mode=pl.Buffered(1) on the weight spec instead of keeping w resident.
    return pl.pallas_call(
        functools.partial(_qkv_kernel, n=n),
        out_shape=(out_sds, out_sds, out_sds),
        grid=(M // bm,),
        in_specs=[
            pl.BlockSpec((bm, E), lambda i: (i, 0)),
            pl.BlockSpec((E, n3), lambda i: (0, 0)),
        ],
        out_specs=(
            pl.BlockSpec((bm, n), lambda i: (i, 0)),
            pl.BlockSpec((bm, n), lambda i: (i, 0)),
            pl.BlockSpec((bm, n), lambda i: (i, 0)),
        ),
        compiler_params=pltpu.CompilerParams(dimension_semantics=("parallel",)),
    )(x2d, w_qkv)


# ----------------------------- attention --------------------------------------


def _attention_kernel(lens_ref, flag_ref, q_ref, k_ref, v_ref, *out_refs,
                      num_heads, causal, need_probs):
    # One (batch*head, query-tile) pair per grid step.  K/V block index is constant
    # over the inner query axis, so their DMA is reused across query tiles.
    if need_probs:
        attn_ref, ctx_ref = out_refs
    else:
        (ctx_ref,) = out_refs

    bh = pl.program_id(0)
    qi = pl.program_id(1)
    b = bh // num_heads                      # mask shared across heads of a batch
    length = lens_ref[b]                     # SMEM scalar read
    # torch: if isinf(score).all(-1).any() -> replace -inf with -1e9 globally.
    # Fully-masked rows occur iff some length <= 0, so the flag depends only on lens.
    fill = jnp.where(flag_ref[0] > 0, jnp.float32(-1e9), jnp.float32(-jnp.inf))

    q = q_ref[0]                             # (tq, Dh) bf16, 1/sqrt(Dh) pre-folded
    k = k_ref[0]                             # (S,  Dh) bf16
    v = v_ref[0]                             # (S,  Dh) bf16
    tq = q.shape[0]
    S = k.shape[0]

    # alignment = (q / sqrt(Dh)) @ k^T   (bf16 MXU inputs, f32 accumulation)
    s = jax.lax.dot_general(
        q, k, (((1,), (1,)), ((), ())), preferred_element_type=jnp.float32
    )                                        # (tq, S)

    # Rebuild pad/causal mask in-kernel (no (B,S,S) HBM mask tensor).
    k_pos = jax.lax.broadcasted_iota(jnp.int32, (tq, S), 1)
    masked = k_pos >= length
    if causal:
        q_pos = qi * tq + jax.lax.broadcasted_iota(jnp.int32, (tq, S), 0)
        masked = jnp.logical_or(masked, k_pos > q_pos)
        # TODO(synk): for causal at realistic S, also tile the key axis and skip
        # fully-masked key tiles (saves ~2x QK^T FLOPs and exp work).
    s = jnp.where(masked, fill, s)

    # softmax over keys (f32 math); exact reciprocal (same EUP slot) for torch parity.
    mx = jnp.max(s, axis=-1, keepdims=True)
    e = jnp.exp(s - mx)
    p = e * pl.reciprocal(jnp.sum(e, axis=-1, keepdims=True), approx=False)

    if need_probs:
        attn_ref[0] = p.astype(attn_ref.dtype)
    # TODO(synk): with head_dim < 128 this ctx store is not lane-dense; real models
    # should keep head_dim >= 128 (or pair heads to N=256 on v6e/v7x).
    ctx_ref[0] = jnp.dot(p.astype(jnp.bfloat16), v,
                         preferred_element_type=jnp.float32).astype(ctx_ref.dtype)


def _attention(q_bh, k_bh, v_bh, lengths, flag, *, num_heads, causal,
               need_probs, probs_dtype):
    BH, S, Dh = q_bh.shape
    tq = _pick_tq(S)
    kern = functools.partial(_attention_kernel, num_heads=num_heads, causal=causal,
                             need_probs=need_probs)

    out_shape = []
    out_specs = []
    if need_probs:
        out_shape.append(jax.ShapeDtypeStruct((BH, S, S), probs_dtype))
        out_specs.append(pl.BlockSpec((1, tq, S), lambda bh, qi, lens, flg: (bh, qi, 0)))
    out_shape.append(jax.ShapeDtypeStruct((BH, S, Dh), jnp.bfloat16))   # bf16 ctx
    out_specs.append(pl.BlockSpec((1, tq, Dh), lambda bh, qi, lens, flg: (bh, qi, 0)))

    probs_bytes = int(jnp.dtype(probs_dtype).itemsize) if need_probs else 0
    cost = pl.CostEstimate(
        flops=4 * BH * S * S * Dh,                      # QK^T + PV
        transcendentals=BH * S * S,                     # exp
        bytes_accessed=2 * 3 * BH * S * Dh              # bf16 q/k/v reads
        + probs_bytes * BH * S * S                      # prob writes (if any)
        + 2 * BH * S * Dh,                              # bf16 ctx writes
    )
    outs = pl.pallas_call(
        kern,
        out_shape=tuple(out_shape),
        grid_spec=pltpu.PrefetchScalarGridSpec(
            num_scalar_prefetch=2,                      # lengths (B,), flag (1,) -> SMEM
            grid=(BH, S // tq),
            in_specs=[
                pl.BlockSpec((1, tq, Dh), lambda bh, qi, lens, flg: (bh, qi, 0)),
                pl.BlockSpec((1, S, Dh), lambda bh, qi, lens, flg: (bh, 0, 0)),
                pl.BlockSpec((1, S, Dh), lambda bh, qi, lens, flg: (bh, 0, 0)),
            ],
            out_specs=tuple(out_specs),
        ),
        compiler_params=pltpu.CompilerParams(
            dimension_semantics=("parallel", "parallel"),
            vmem_limit_bytes=32 * 1024 * 1024,
        ),
        cost_estimate=cost,
    )(lengths, flag, q_bh, k_bh, v_bh)
    return outs if isinstance(outs, (tuple, list)) else (outs,)


# ----------------------------- out-proj + residual ----------------------------


def _outproj_kernel(lens_ref, ctx_ref, w_ref, b_ref, x_ref, o_ref, *, bm, seq_len):
    # out = ((ctx @ W_out^T + b) * query_mask) + x     (dropout p=0 -> identity)
    # Query mask rebuilt from SMEM lengths: each row tile lies within one batch.
    i = pl.program_id(0)
    blocks_per_batch = seq_len // bm
    b = i // blocks_per_batch
    start_s = (i % blocks_per_batch) * bm
    length = lens_ref[b]

    y = (jnp.dot(ctx_ref[...], w_ref[...], preferred_element_type=jnp.float32)
         + b_ref[...])
    s_pos = start_s + jax.lax.broadcasted_iota(jnp.int32, (bm, 1), 0)
    # torch masks AFTER the bias add (bias zeroed on padded query rows too).
    o_ref[...] = jnp.where(s_pos < length, y, 0.0) + x_ref[...]


def _outproj_residual(ctx2d, w_t, b_row, x2d, lengths, bm, seq_len):
    M, K = ctx2d.shape
    N = w_t.shape[1]
    return pl.pallas_call(
        functools.partial(_outproj_kernel, bm=bm, seq_len=seq_len),
        out_shape=jax.ShapeDtypeStruct((M, N), jnp.float32),
        grid_spec=pltpu.PrefetchScalarGridSpec(
            num_scalar_prefetch=1,                       # lengths (B,) -> SMEM
            grid=(M // bm,),
            in_specs=[
                pl.BlockSpec((bm, K), lambda i, lens: (i, 0)),
                pl.BlockSpec((K, N), lambda i, lens: (0, 0)),
                pl.BlockSpec((1, N), lambda i, lens: (0, 0)),
                pl.BlockSpec((bm, N), lambda i, lens: (i, 0)),
            ],
            out_specs=pl.BlockSpec((bm, N), lambda i, lens: (i, 0)),
        ),
        compiler_params=pltpu.CompilerParams(dimension_semantics=("parallel",)),
    )(lengths, ctx2d, w_t, b_row, x2d)


# ----------------------------- param prep (once, outside the forward) ---------


def prepare_params(raw):
    """Hoists all transpose/cast/concat work out of the forward path (done once)."""
    H = raw["num_heads"]
    d_out = raw["w_query"].shape[0]
    Dh = d_out // H
    inv_scale = 1.0 / math.sqrt(Dh)
    # 1/sqrt(head_dim) folded into w_query: free at runtime, semantically identical.
    w_qkv = jnp.concatenate(
        [raw["w_query"].T * inv_scale, raw["w_key"].T, raw["w_value"].T], axis=1
    ).astype(jnp.bfloat16)
    return {
        "num_heads": H,
        "d_out": d_out,
        "head_dim": Dh,
        "w_qkv": w_qkv,                                        # (E, 3*d_out) bf16
        "w_out_t": raw["out_proj_w"].T.astype(jnp.bfloat16),   # (d_out, E) bf16
        "b_out": raw["out_proj_b"][None, :].astype(jnp.float32),
    }


# ----------------------------- forward (glue) ----------------------------------


def multi_head_attention(x, prep, input_lengths=None, causal=False,
                         need_weights=True, probs_dtype=jnp.float32):
    """Returns (output_skip, attention_scores) exactly like the torch module.
    Set need_weights=False to skip the (B,H,S,S) probability store entirely, or
    probs_dtype=jnp.bfloat16 to halve its HBM traffic."""
    B, S, E = x.shape
    H = prep["num_heads"]
    d_out = prep["d_out"]
    Dh = prep["head_dim"]
    M = B * S

    x2d = x.reshape(M, E)
    bm = _pick_block_rows(M)

    # Fused Q/K/V projection: x read once, one MXU pass, three bf16 outputs.
    q_lin, k_lin, v_lin = _qkv_proj(x2d, prep["w_qkv"], bm)

    # torch: .view(batch, num_heads, seq_len, head_dim) on contiguous (B, S, d_out)
    # == flat-order reshape. Flatten (B, H) for the per-(batch,head) kernel grid.
    q_bh = q_lin.reshape(B * H, S, Dh)
    k_bh = k_lin.reshape(B * H, S, Dh)
    v_bh = v_lin.reshape(B * H, S, Dh)

    # Scalar prefetch operands: per-batch lengths + the global "-1e9 fix-up" flag.
    if input_lengths is None:
        lengths = jnp.full((B,), S, dtype=jnp.int32)
        flag = jnp.zeros((1,), jnp.int32)
    else:
        lengths = input_lengths.astype(jnp.int32)
        flag = jnp.any(lengths <= 0).astype(jnp.int32).reshape(1)

    outs = _attention(q_bh, k_bh, v_bh, lengths, flag, num_heads=H, causal=causal,
                      need_probs=need_weights, probs_dtype=probs_dtype)
    if need_weights:
        attn_bh, ctx_bh = outs
        attention_scores = attn_bh.reshape(B, H, S, S)
    else:
        (ctx_bh,) = outs
        attention_scores = None

    # torch: context.view(batch, seq_len, num_heads*head_dim) == flat-order reshape
    ctx2d = ctx_bh.reshape(M, d_out)

    # TODO(synk): nn.Dropout with p=0.0 is the identity; stochastic dropout not implemented.
    bm_o = _largest_divisor(S, (256, 128, 64, 32, 16, 8))   # tile within one batch
    out_skip2d = _outproj_residual(ctx2d, prep["w_out_t"], prep["b_out"], x2d,
                                   lengths, bm_o, S)
    return out_skip2d.reshape(B, S, E), attention_scores


# ----------------------------- main ---------------------------------------------


if __name__ == "__main__":
    # Small shapes consistent with the module.
    batch, seq_len, embed_size = 2, 8, 32
    d_out_n_heads, num_heads = 32, 4

    key = jax.random.PRNGKey(0)
    k_x, k_q, k_k, k_v, k_o, k_b = jax.random.split(key, 6)

    raw_params = {
        "num_heads": num_heads,
        # nn.Linear(embed_size, d_out) weight shape: (d_out, embed_size)
        "w_query": 0.05 * jax.random.normal(k_q, (d_out_n_heads, embed_size), jnp.float32),
        "w_key": 0.05 * jax.random.normal(k_k, (d_out_n_heads, embed_size), jnp.float32),
        "w_value": 0.05 * jax.random.normal(k_v, (d_out_n_heads, embed_size), jnp.float32),
        # nn.Linear(d_out, embed_size) weight shape: (embed_size, d_out)
        "out_proj_w": 0.05 * jax.random.normal(k_o, (embed_size, d_out_n_heads), jnp.float32),
        "out_proj_b": 0.05 * jax.random.normal(k_b, (embed_size,), jnp.float32),
    }
    params = prepare_params(raw_params)   # one-time weight transpose/cast/concat

    x = jax.random.normal(k_x, (batch, seq_len, embed_size), jnp.float32)
    input_lengths = jnp.array([8, 5], dtype=jnp.int32)

    out_skip, attn = multi_head_attention(x, params, input_lengths=input_lengths,
                                          causal=True)
    jax.block_until_ready((out_skip, attn))

    assert out_skip.shape == x.shape
    assert attn.shape == (batch, num_heads, seq_len, seq_len)
    print("KERNEL_OK")
</pallas_src>

<mosaic_0001>
module attributes {stable_mosaic.version = 11 : i64} {
  func.func @_qkv_kernel(%arg0: i32, %arg1: memref<16x32xf32, #tpu.memory_space<vmem>>, %arg2: memref<32x96xbf16, #tpu.memory_space<vmem>>, %arg3: memref<16x32xbf16, #tpu.memory_space<vmem>>, %arg4: memref<16x32xbf16, #tpu.memory_space<vmem>>, %arg5: memref<16x32xbf16, #tpu.memory_space<vmem>>) attributes {dimension_semantics = [#tpu.dimension_semantics<parallel>], iteration_bounds = array<i64: 1>, scalar_prefetch = 0 : i64, scratch_operands = 0 : i64, tpu.core_type = #tpu.core_type<tc>, window_params = [{transform_indices = @transform_0, window_bounds = array<i64: 16, 32>}, {pipeline_mode = #tpu.pipeline_mode<synchronous>, transform_indices = @transform_1, window_bounds = array<i64: 32, 96>}, {transform_indices = @transform_2, window_bounds = array<i64: 16, 32>}, {transform_indices = @transform_3, window_bounds = array<i64: 16, 32>}, {transform_indices = @transform_4, window_bounds = array<i64: 16, 32>}]} {
    %c0 = arith.constant 0 : index
    %c0_0 = arith.constant 0 : index
    %0 = vector.load %arg1[%c0, %c0_0] : memref<16x32xf32, #tpu.memory_space<vmem>>, vector<16x32xf32>
    %1 = arith.truncf %0 : vector<16x32xf32> to vector<16x32xbf16>
    %c0_1 = arith.constant 0 : index
    %c0_2 = arith.constant 0 : index
    %2 = vector.load %arg2[%c0_1, %c0_2] : memref<32x96xbf16, #tpu.memory_space<vmem>>, vector<32x96xbf16>
    %cst = arith.constant dense<0.000000e+00> : vector<16x96xf32>
    %3 = tpu.matmul %1, %2, %cst {dimension_numbers = #tpu.dot_dimension_numbers<[1], [0], [0], [1], [0, 0, 1, 1], [], []>} : vector<16x32xbf16>, vector<32x96xbf16>, vector<16x96xf32> -> vector<16x96xf32>
    %4 = vector.extract_strided_slice %3 {offsets = [0, 0], sizes = [16, 32], strides = [1, 1]} : vector<16x96xf32> to vector<16x32xf32>
    %5 = arith.truncf %4 : vector<16x32xf32> to vector<16x32xbf16>
    %c0_3 = arith.constant 0 : index
    %c0_4 = arith.constant 0 : index
    %6 = vector.load %arg3[%c0_3, %c0_4] : memref<16x32xbf16, #tpu.memory_space<vmem>>, vector<16x32xbf16>
    tpu.vector_store %arg3[%c0_3, %c0_4], %5 {strides = array<i32>} : memref<16x32xbf16, #tpu.memory_space<vmem>>, vector<16x32xbf16>,
    %7 = vector.extract_strided_slice %3 {offsets = [0, 32], sizes = [16, 32], strides = [1, 1]} : vector<16x96xf32> to vector<16x32xf32>
    %8 = arith.truncf %7 : vector<16x32xf32> to vector<16x32xbf16>
    %c0_5 = arith.constant 0 : index
    %c0_6 = arith.constant 0 : index
    %9 = vector.load %arg4[%c0_5, %c0_6] : memref<16x32xbf16, #tpu.memory_space<vmem>>, vector<16x32xbf16>
    tpu.vector_store %arg4[%c0_5, %c0_6], %8 {strides = array<i32>} : memref<16x32xbf16, #tpu.memory_space<vmem>>, vector<16x32xbf16>,
    %10 = vector.extract_strided_slice %3 {offsets = [0, 64], sizes = [16, 32], strides = [1, 1]} : vector<16x96xf32> to vector<16x32xf32>
    %11 = arith.truncf %10 : vector<16x32xf32> to vector<16x32xbf16>
    %c0_7 = arith.constant 0 : index
    %c0_8 = arith.constant 0 : index
    %12 = vector.load %arg5[%c0_7, %c0_8] : memref<16x32xbf16, #tpu.memory_space<vmem>>, vector<16x32xbf16>
    tpu.vector_store %arg5[%c0_7, %c0_8], %11 {strides = array<i32>} : memref<16x32xbf16, #tpu.memory_space<vmem>>, vector<16x32xbf16>,
    return
  }
  func.func @transform_0(%arg0: i32) -> (i32, i32) {
    %c0_i32 = arith.constant 0 : i32
    %c0_i32_0 = arith.constant 0 : i32
    return %arg0, %c0_i32 : i32, i32
  }
  func.func @transform_1(%arg0: i32) -> (i32, i32) {
    %c0_i32 = arith.constant 0 : i32
    %c0_i32_0 = arith.constant 0 : i32
    %c0_i32_1 = arith.constant 0 : i32
    return %c0_i32, %c0_i32_0 : i32, i32
  }
  func.func @transform_2(%arg0: i32) -> (i32, i32) {
    %c0_i32 = arith.constant 0 : i32
    %c0_i32_0 = arith.constant 0 : i32
    return %arg0, %c0_i32 : i32, i32
  }
  func.func @transform_3(%arg0: i32) -> (i32, i32) {
    %c0_i32 = arith.constant 0 : i32
    %c0_i32_0 = arith.constant 0 : i32
    return %arg0, %c0_i32 : i32, i32
  }
  func.func @transform_4(%arg0: i32) -> (i32, i32) {
    %c0_i32 = arith.constant 0 : i32
    %c0_i32_0 = arith.constant 0 : i32
    return %arg0, %c0_i32 : i32, i32
  }
}

</mosaic_0001>

<bundles_post_ra>
// kernel: tpu_custom_call.1
= control target key start
LH: loop header
LB: loop body
LE: loop exit
PB: predicated region body
PF: predicated region fallthrough
CT: control target
= control target key end

     0   :  { %10 = vsyncpa [#allocation3], 0  ;;  %s459_s0 = inlined_call_operand.hbm [shape: f32[16,32], index: 0, kind: input, shape index: {}]   ;;  %s460_s1 = inlined_call_operand.hbm [shape: bf16[32,96], index: 1, kind: input, shape index: {}]   ;;  %s461_s2 = inlined_call_operand.hbm [shape: bf16[16,32], index: 2, kind: output, shape index: {0}]   ;;  %s462_s3 = inlined_call_operand.hbm [shape: bf16[16,32], index: 3, kind: output, shape index: {1}]   ;;  %s463_s4 = inlined_call_operand.hbm [shape: bf16[16,32], index: 4, kind: output, shape index: {2}]  }
   0x1   :  { %11 = vsyncpa [#allocation6], 0 }
   0x2   :  { %12 = vsyncpa [#allocation4], 0 }
   0x3   :  { %13 = vsyncpa [#allocation9], 0  ;;  %s335_s15 = smov [#allocation2]   ;;  %s217_s19 = scalar_lea.hbm %s459_s0, 256 }
   0x4   :  { %s19_s16 = sshll.u32 %s335_s15, 4  ;;  %p218_p0 = scmp.ne.s32.totalorder %s459_s0, %s217_s19  ;;  %s20_s16 = int_to_ptr.vmem [resolvable:$true] %s19_s16 }
   0x5   :  { %p221_p1 = scmp.lt.u32.totalorder %s217_s19, %s459_s0 }
   0x7   :  { %p223_p2 = pnand %p221_p1, %p218_p0 }
   0x9   :  { %226 = shalt.err (!%p223_p2)
}
   0xa   :  { %s227_s24 = scalar_lea.vmem %s20_s16, 256  ;;  %p232_p4 = scmp.lt.s32.totalorder %s20_s16, %s20_s16 }
   0xb   :  { %p228_p3 = scmp.ne.s32.totalorder %s20_s16, %s227_s24  ;;  %p233_p5 = scmp.lt.s32.totalorder %s227_s24, %s227_s24 }
   0xd   :  { %p234_p6 = por %p233_p5, %p232_p4 }
   0xf   :  { %p235_p7 = pnand %p234_p6, %p228_p3 }
  0x11   :  { %238 = shalt.err (!%p235_p7)
}
  0x12   :  { %s336_s25 = smov 128   ;;  %s337_s26 = smov 8  }
  0x13   :  { %25 = dma.hbm_to_vmem [thread:$0]  %s459_s0, 256, %s20_s16, [#allocation3], %s336_s25, %s336_s25, %s337_s26  }
  0x14   :  { %s338_s29 = smov [#allocation5]   ;;  %s239_s7 = scalar_lea.hbm %s460_s1, 256 }
  0x15   :  { %s31_s30 = sshll.u32 %s338_s29, 4  ;;  %p240_p8 = scmp.ne.s32.totalorder %s460_s1, %s239_s7  ;;  %s32_s30 = int_to_ptr.vmem [resolvable:$true] %s31_s30 }
  0x16   :  { %p243_p9 = scmp.lt.u32.totalorder %s239_s7, %s460_s1 }
  0x18   :  { %p245_p10 = pnand %p243_p9, %p240_p8 }
  0x1a   :  { %248 = shalt.err (!%p245_p10)
}
  0x1b   :  { %s249_s12 = scalar_lea.vmem %s32_s30, 256  ;;  %p254_p12 = scmp.lt.s32.totalorder %s32_s30, %s32_s30 }
  0x1c   :  { %p250_p11 = scmp.ne.s32.totalorder %s32_s30, %s249_s12  ;;  %p255_p13 = scmp.lt.s32.totalorder %s249_s12, %s249_s12 }
  0x1e   :  { %p256_p0 = por %p255_p13, %p254_p12 }
  0x20   :  { %p257_p1 = pnand %p256_p0, %p250_p11 }
  0x22   :  { %260 = shalt.err (!%p257_p1)
}
  0x23   :  { %s339_s0 = smov 64   ;;  %s340_s13 = smov 4  }
  0x24   :  { %37 = dma.hbm_to_vmem [thread:$0]  %s460_s1, 256, %s32_s30, [#allocation6], %s339_s0, %s339_s0, %s340_s13  }
  0x25   :  { %327 = dma.done.wait [#allocation3], 256  }
  0x26   :  { %328 = vsyncadd [#allocation3], 4294967040 }
  0x27   :  { %329 = dma.done.wait [#allocation6], 256  }
  0x28   :  { %330 = vsyncadd [#allocation6], 4294967040  ;;  %v341_v0 = vmov 0.0   ;;  %vm342_vm0 = vmmov 0   ;;  %v215_v1 = vld [vmem:[#allocation5] sm:$0xff]   ;;  %v216_v2 = vld [vmem:[#allocation5 + $0x8] sm:$0xff]  }
  0x29   :  { %195 = vmatprep.subr.bf16.mxu0 %v341_v0  ;;  %199 = vmatprep.mubr.msk.bf16.mxu0 %vm342_vm0, %v341_v0  ;;  %v45_v3 = vld [vmem:[#allocation2] sm:$0xff]  ;;  %v46_v4 = vld [vmem:[#allocation2 + $0x8] sm:$0xff]  ;;  %vm64_vm1 = vcmask 261120   ;;  %vm117_vm2 = vcmask 257024   ;;  %s343_s1 = smov [#allocation7]   ;;  %s344_s17 = smov 96  }
  0x2a   :  { %196 = vmatpush3.bf16.msra.mxu0 %v215_v1  ;;  %v47_v5 = vpack.c.bf16 %v46_v4, %v45_v3  ;;  %s141_s16 = sshll.u32 %s343_s1, 4  ;;  %s142_s16 = int_to_ptr.vmem [resolvable:$true] %s141_s16 }
  0x2b   :  { %197 = vmatprep.subr.bf16.mxu0 %v341_v0  ;;  %s261_s18 = scalar_lea.vmem %s142_s16, 128  ;;  %p266_p3 = scmp.lt.s32.totalorder %s142_s16, %s142_s16 }
  0x2c   :  { %p262_p2 = scmp.ne.s32.totalorder %s142_s16, %s261_s18  ;;  %p267_p4 = scmp.lt.s32.totalorder %s261_s18, %s261_s18 }
  0x2e   :  { %198 = vmatpush3.bf16.msra.mxu0 %v216_v2  ;;  %p268_p5 = por %p267_p4, %p266_p3 }
  0x30   :  { %p269_p6 = pnand %p268_p5, %p262_p2 }
  0x31   :  { %200 = vmatmul.mubr.msk.bf16.vlgmr.msra.gmra.mrb[0].mxu0 %vm64_vm1, %v47_v5 }
 0x104   :  { %v102_v6 = vpop.f32.mrb[0].mxu0 }
 0x105   :  { %v190_v7 = vpack.c.bf16 %v102_v6, %v102_v6  ;;  %v201_v8 = vpop.f32.mrb[1].mxu0 }
 0x106   :  { %v105_v9 = vpop.f32.mrb[2].mxu0 }
 0x107   :  { %v191_v10 = vpack.c.bf16 %v105_v9, %v105_v9  ;;  %128 = vrot.lane.b32.xlu1 %v190_v7, %s339_s0  ;;  %120 = vrot.lane.b32.xlu0 %v190_v7, %s344_s17  ;;  %v202_v11 = vpop.f32.mrb[3].mxu0  ;;  %118 = vst.msk [vmem:[#allocation7] sm:$0xf] %vm117_vm2, %v190_v7 }
 0x109   :  { %119 = vst.msk [vmem:[#allocation7 + $0x4] sm:$0xf] %vm117_vm2, %v191_v10 }
 0x10a   :  { %272 = shalt.err (!%p269_p6)
}
 0x10b   :  { %s273_s21 = scalar_lea.hbm %s461_s2, 128 }
 0x10c   :  { %p274_p7 = scmp.ne.s32.totalorder %s461_s2, %s273_s21  ;;  %p277_p8 = scmp.lt.u32.totalorder %s273_s21, %s461_s2 }
 0x10e   :  { %p279_p9 = pnand %p277_p8, %p274_p7 }
 0x110   :  { %282 = shalt.err (!%p279_p9)
}
 0x111   :  { %147 = dma.vmem_to_hbm [thread:$0]  %s142_s16, 128, %s461_s2, [#allocation4], %s339_s0, %s339_s0, %s340_s13  }
 0x112   :  { %130 = vrot.lane.b32.xlu1 %v191_v10, %s339_s0  ;;  %122 = vrot.lane.b32.xlu0 %v191_v10, %s344_s17  ;;  %s345_s28 = smov [#allocation8]   ;;  %s346_s30 = smov [#allocation10]  }
 0x113   :  { %s153_s29 = sshll.u32 %s345_s28, 4  ;;  %s165_s5 = sshll.u32 %s346_s30, 4  ;;  %s154_s29 = int_to_ptr.vmem [resolvable:$true] %s153_s29  ;;  %s420_s5 = int_to_ptr.vmem [resolvable:$true] %s165_s5 }
 0x114   :  { %s283_s2 = scalar_lea.vmem %s154_s29, 128  ;;  %p288_p11 = scmp.lt.s32.totalorder %s154_s29, %s154_s29 }
 0x115   :  { %p284_p10 = scmp.ne.s32.totalorder %s154_s29, %s283_s2  ;;  %p289_p12 = scmp.lt.s32.totalorder %s283_s2, %s283_s2 }
 0x117   :  { %p290_p13 = por %p289_p12, %p288_p11 }
 0x119   :  { %p291_p0 = pnand %p290_p13, %p284_p10 }
 0x179   :  { %v129_v12 = vpop.permute.xlu1 %128  ;;  %v121_v13 = vpop.permute.xlu0 %120 }
 0x17a   :  { %134 = vst.msk [vmem:[#allocation10] sm:$0xf] %vm117_vm2, %v129_v12  ;;  %126 = vst.msk [vmem:[#allocation8] sm:$0xf] %vm117_vm2, %v121_v13 }
 0x184   :  { %v131_v14 = vpop.permute.xlu1 %130  ;;  %v123_v15 = vpop.permute.xlu0 %122 }
 0x185   :  { %135 = vst.msk [vmem:[#allocation10 + $0x4] sm:$0xf] %vm117_vm2, %v131_v14  ;;  %127 = vst.msk [vmem:[#allocation8 + $0x4] sm:$0xf] %vm117_vm2, %v123_v15 }
 0x186   :  { %294 = shalt.err (!%p291_p0)
}
 0x187   :  { %s295_s8 = scalar_lea.hbm %s462_s3, 128 }
 0x188   :  { %p296_p1 = scmp.ne.s32.totalorder %s462_s3, %s295_s8  ;;  %p299_p2 = scmp.lt.u32.totalorder %s295_s8, %s462_s3 }
 0x18a   :  { %p301_p3 = pnand %p299_p2, %p296_p1 }
 0x18c   :  { %304 = shalt.err (!%p301_p3)
}
 0x18d   :  { %159 = dma.vmem_to_hbm [thread:$0]  %s154_s29, 128, %s462_s3, [#allocation9], %s339_s0, %s339_s0, %s340_s13  }
 0x18e   :  { %s305_s1 = scalar_lea.vmem %s420_s5, 128  ;;  %p310_p5 = scmp.lt.s32.totalorder %s420_s5, %s420_s5 }
 0x18f   :  { %p306_p4 = scmp.ne.s32.totalorder %s420_s5, %s305_s1  ;;  %p311_p6 = scmp.lt.s32.totalorder %s305_s1, %s305_s1 }
 0x191   :  { %p312_p7 = por %p311_p6, %p310_p5 }
 0x193   :  { %p313_p8 = pnand %p312_p7, %p306_p4 }
 0x195   :  { %316 = shalt.err (!%p313_p8)
}
 0x196   :  { %s317_s18 = scalar_lea.hbm %s463_s4, 128 }
 0x197   :  { %p318_p9 = scmp.ne.s32.totalorder %s463_s4, %s317_s18  ;;  %p321_p10 = scmp.lt.u32.totalorder %s317_s18, %s463_s4 }
 0x199   :  { %p323_p11 = pnand %p321_p10, %p318_p9 }
 0x19b   :  { %326 = shalt.err (!%p323_p11)
}
 0x19c   :  { %171 = dma.vmem_to_hbm [thread:$0]  %s420_s5, 128, %s463_s4, [#allocation9], %s339_s0, %s339_s0, %s340_s13  }
 0x19d   :  { %331 = dma.done.wait [#allocation4], 128  }
 0x19e   :  { %332 = vsyncadd [#allocation4], 4294967168 }
 0x19f   :  { %333 = dma.done.wait [#allocation9], 256  }
 0x1a0   :  { %334 = vsyncadd [#allocation9], 4294967040 }
 0x1a1   :  { %181 = vsyncpa [#allocation3], 1 }
 0x1a2   :  { %182 = vsyncpa [#allocation6], 1 }
 0x1a3   :  { %183 = vsyncpa [#allocation4], 1 }
 0x1a4   :  { %184 = vsyncpa [#allocation9], 1 }

</bundles_post_ra>
